<compile_context>
chip_gen: v7x
topology: tpu7x:2x2x1
jax: 0.10.0
libtpu: 0.0.40
codegen_flags: <defaults>
</compile_context>

<pallas_src>
import math
from functools import partial

import jax
import jax.numpy as jnp
from jax.experimental import pallas as pl
from jax.experimental.pallas import tpu as pltpu

# small, module-consistent shapes
B, S, D, H, FF = 2, 8, 32, 4, 64
HD = D // H
BS = B * S
EPS = 1e-5  # nn.LayerNorm default


def _layernorm(x, gamma, beta):
    mean = jnp.mean(x, axis=-1, keepdims=True)
    var = jnp.mean((x - mean) ** 2, axis=-1, keepdims=True)  # biased, like PyTorch
    return (x - mean) * jax.lax.rsqrt(var + EPS) * gamma + beta


def encoder_kernel(x_ref,
                   wqkv_ref, bqkv_ref, wo_ref, bo_ref,
                   g1_ref, be1_ref,
                   w1_ref, b1_ref, w2_ref, b2_ref,
                   g2_ref, be2_ref,
                   y_ref, attn_ref):
    x = x_ref[...]                        # (B*S, D) f32, all batches at once
    xb = x.astype(jnp.bfloat16)

    # --- fused QKV projection: one (B*S, D) @ (D, 3D) MXU matmul ---
    # (Q columns / bias are pre-scaled by 1/sqrt(head_dim) at pack time.)
    qkv = jnp.dot(xb, wqkv_ref[...],
                  preferred_element_type=jnp.float32) + bqkv_ref[...]    # (B*S, 3D)

    # Split into head-batched (H*B, S, HD) tensors; heads/batch sit on the
    # LEADING axis (g = h*B + b) so attention is a plain batched 3-D dot.
    # S == 8 matches the sublane tile, so (B*S, HD) -> (B, S, HD) is a free
    # leading-dim regroup; the concat runs along a leading axis only.
    def to_heads(m):                      # (B*S, H*HD) -> (H*B, S, HD)
        return jnp.concatenate(
            [m[:, h * HD:(h + 1) * HD].reshape(B, S, HD) for h in range(H)],
            axis=0)

    q = to_heads(qkv[:, :D]).astype(jnp.bfloat16)        # already scaled
    k = to_heads(qkv[:, D:2 * D]).astype(jnp.bfloat16)
    v = to_heads(qkv[:, 2 * D:]).astype(jnp.bfloat16)

    # --- scaled dot-product attention, all heads & batches batched ---
    scores = jnp.einsum('gqd,gkd->gqk', q, k,
                        preferred_element_type=jnp.float32)              # (H*B,S,S)
    scores = scores - jnp.max(scores, axis=-1, keepdims=True)
    e = jnp.exp(scores)
    w = e * pl.reciprocal(jnp.sum(e, axis=-1, keepdims=True), approx=True)
    attn_ref[...] = w                     # single dense store of all heads

    ctx = jnp.einsum('gqk,gkd->gqd', w.astype(jnp.bfloat16), v,
                     preferred_element_type=jnp.float32)                 # (H*B,S,HD)

    # back to (B*S, D) with head-major feature order (matches out_proj rows)
    ctx2 = jnp.concatenate(
        [ctx[h * B:(h + 1) * B].reshape(BS, HD) for h in range(H)], axis=-1)

    attn_out = jnp.dot(ctx2.astype(jnp.bfloat16), wo_ref[...],
                       preferred_element_type=jnp.float32) + bo_ref[...]

    # --- residual + LayerNorm (dropout == identity in eval mode) ---
    x1 = _layernorm(x + attn_out, g1_ref[...], be1_ref[...])

    # --- FeedForward: linear1 -> relu -> (dropout) -> linear2 ---
    hdn = jnp.maximum(
        jnp.dot(x1.astype(jnp.bfloat16), w1_ref[...],
                preferred_element_type=jnp.float32) + b1_ref[...], 0.0)  # (B*S, FF)
    ffn = jnp.dot(hdn.astype(jnp.bfloat16), w2_ref[...],
                  preferred_element_type=jnp.float32) + b2_ref[...]      # (B*S, D)

    # note: the original `x + self.dropout(ffn_output)` no-op line is dropped
    y_ref[...] = _layernorm(x1 + ffn, g2_ref[...], be2_ref[...])


@partial(jax.jit, static_argnums=())
def transformer_encoder(x, kparams):
    """x: (B, S, D) float32.  kparams: fused/packed kernel parameters."""
    x_flat = x.reshape(BS, D)             # collapse batch: one kernel invocation
    vmem = pl.BlockSpec(memory_space=pltpu.MemorySpace.VMEM)
    y_flat, attn_g = pl.pallas_call(
        encoder_kernel,
        in_specs=[vmem] * (1 + len(kparams)),
        out_specs=(vmem, vmem),
        out_shape=(
            jax.ShapeDtypeStruct((BS, D), jnp.float32),
            jax.ShapeDtypeStruct((H * B, S, S), jnp.float32),
        ),
    )(x_flat, *kparams)
    y = y_flat.reshape(B, S, D)
    attn = attn_g.reshape(H, B, S, S).transpose(1, 0, 2, 3)   # (B, H, S, S)
    return y, attn


# ---------------- deterministic parameter init (PyTorch-style uniform) ----------------
def init_linear(key, fan_in, fan_out):
    kw, kb = jax.random.split(key)
    bound = 1.0 / math.sqrt(fan_in)
    # stored already transposed: (in, out)
    w = jax.random.uniform(kw, (fan_in, fan_out), jnp.float32, -bound, bound)
    b = jax.random.uniform(kb, (1, fan_out), jnp.float32, -bound, bound)
    return w, b


def make_raw_params(key):
    ks = jax.random.split(key, 6)
    wq, bq = init_linear(ks[0], D, D)
    wk, bk = init_linear(ks[1], D, D)
    wv, bv = init_linear(ks[2], D, D)
    wo, bo = init_linear(ks[3], D, D)
    g1, be1 = jnp.ones((1, D), jnp.float32), jnp.zeros((1, D), jnp.float32)
    w1, b1 = init_linear(ks[4], D, FF)
    w2, b2 = init_linear(ks[5], FF, D)
    g2, be2 = jnp.ones((1, D), jnp.float32), jnp.zeros((1, D), jnp.float32)
    return (wq, bq, wk, bk, wv, bv, wo, bo, g1, be1, w1, b1, w2, b2, g2, be2)


def pack_kernel_params(raw):
    """Fuse Q/K/V weights into one (D, 3D) matrix; fold the 1/sqrt(head_dim)
    attention scale into the Q columns; cast matmul weights to bf16."""
    (wq, bq, wk, bk, wv, bv, wo, bo, g1, be1, w1, b1, w2, b2, g2, be2) = raw
    inv_scale = 1.0 / math.sqrt(HD)       # PyTorch divides by head_dim ** 0.5
    wqkv = jnp.concatenate([wq * inv_scale, wk, wv], axis=1).astype(jnp.bfloat16)
    bqkv = jnp.concatenate([bq * inv_scale, bk, bv], axis=1)   # (1, 3D) f32
    return (wqkv, bqkv,
            wo.astype(jnp.bfloat16), bo,
            g1, be1,
            w1.astype(jnp.bfloat16), b1,
            w2.astype(jnp.bfloat16), b2,
            g2, be2)


# ---------------- pure-JAX f32 reference for a correctness check ----------------
def reference(x, raw):
    (wq, bq, wk, bk, wv, bv, wo, bo, g1, be1, w1, b1, w2, b2, g2, be2) = raw
    q = x @ wq + bq
    k = x @ wk + bk
    v = x @ wv + bv
    qh = q.reshape(B, S, H, HD).transpose(0, 2, 1, 3)
    kh = k.reshape(B, S, H, HD).transpose(0, 2, 1, 3)
    vh = v.reshape(B, S, H, HD).transpose(0, 2, 1, 3)
    scores = (qh @ kh.transpose(0, 1, 3, 2)) / math.sqrt(HD)
    w = jax.nn.softmax(scores, axis=-1)
    ctx = (w @ vh).transpose(0, 2, 1, 3).reshape(B, S, D)
    attn_out = ctx @ wo + bo
    x1 = _layernorm(x + attn_out, g1, be1)
    ffn = jnp.maximum(x1 @ w1 + b1, 0.0) @ w2 + b2
    y = _layernorm(x1 + ffn, g2, be2)
    return y, w


if __name__ == "__main__":
    key = jax.random.PRNGKey(0)
    kx, kp = jax.random.split(key)
    x = jax.random.normal(kx, (B, S, D), jnp.float32)
    raw = make_raw_params(kp)
    kparams = pack_kernel_params(raw)

    y, attn_w = transformer_encoder(x, kparams)
    y, attn_w = jax.block_until_ready((y, attn_w))

    y_ref, w_ref = reference(x, raw)
    assert y.shape == (B, S, D) and attn_w.shape == (B, H, S, S)
    # slightly looser tolerance: kernel uses bf16 matmul inputs (f32 accumulate)
    # and an approximate (EUP) reciprocal in softmax; reference is pure f32.
    assert jnp.allclose(y, y_ref, atol=3e-2, rtol=3e-2)
    assert jnp.allclose(attn_w, w_ref, atol=3e-2, rtol=3e-2)

    # TODO(synk): dropout (p=0.1) is implemented as identity (eval mode);
    # training-mode stochastic dropout is not reproduced.
    print("KERNEL_OK")
</pallas_src>

<mosaic_0001>
module attributes {stable_mosaic.version = 11 : i64} {
  func.func @encoder_kernel(%arg0: memref<16x32xf32, #tpu.memory_space<vmem>>, %arg1: memref<32x96xbf16, #tpu.memory_space<vmem>>, %arg2: memref<1x96xf32, #tpu.memory_space<vmem>>, %arg3: memref<32x32xbf16, #tpu.memory_space<vmem>>, %arg4: memref<1x32xf32, #tpu.memory_space<vmem>>, %arg5: memref<1x32xf32, #tpu.memory_space<vmem>>, %arg6: memref<1x32xf32, #tpu.memory_space<vmem>>, %arg7: memref<32x64xbf16, #tpu.memory_space<vmem>>, %arg8: memref<1x64xf32, #tpu.memory_space<vmem>>, %arg9: memref<64x32xbf16, #tpu.memory_space<vmem>>, %arg10: memref<1x32xf32, #tpu.memory_space<vmem>>, %arg11: memref<1x32xf32, #tpu.memory_space<vmem>>, %arg12: memref<1x32xf32, #tpu.memory_space<vmem>>, %arg13: memref<16x32xf32, #tpu.memory_space<vmem>>, %arg14: memref<8x8x8xf32, #tpu.memory_space<vmem>>) attributes {dimension_semantics = [], scalar_prefetch = 0 : i64, scratch_operands = 0 : i64, tpu.core_type = #tpu.core_type<tc>} {
    %c0 = arith.constant 0 : index
    %c0_0 = arith.constant 0 : index
    %0 = vector.load %arg0[%c0, %c0_0] : memref<16x32xf32, #tpu.memory_space<vmem>>, vector<16x32xf32>
    %1 = arith.truncf %0 : vector<16x32xf32> to vector<16x32xbf16>
    %c0_1 = arith.constant 0 : index
    %c0_2 = arith.constant 0 : index
    %2 = vector.load %arg1[%c0_1, %c0_2] : memref<32x96xbf16, #tpu.memory_space<vmem>>, vector<32x96xbf16>
    %cst = arith.constant dense<0.000000e+00> : vector<16x96xf32>
    %3 = tpu.matmul %1, %2, %cst {dimension_numbers = #tpu.dot_dimension_numbers<[1], [0], [0], [1], [0, 0, 1, 1], [], []>} : vector<16x32xbf16>, vector<32x96xbf16>, vector<16x96xf32> -> vector<16x96xf32>
    %c0_3 = arith.constant 0 : index
    %c0_4 = arith.constant 0 : index
    %4 = vector.load %arg2[%c0_3, %c0_4] : memref<1x96xf32, #tpu.memory_space<vmem>>, vector<1x96xf32>
    %5 = vector.broadcast %4 : vector<1x96xf32> to vector<16x96xf32>
    %6 = arith.addf %3, %5 : vector<16x96xf32>
    %7 = vector.extract_strided_slice %6 {offsets = [0, 0], sizes = [16, 32], strides = [1, 1]} : vector<16x96xf32> to vector<16x32xf32>
    %8 = vector.extract_strided_slice %7 {offsets = [0, 0], sizes = [16, 8], strides = [1, 1]} : vector<16x32xf32> to vector<16x8xf32>
    %9 = vector.shape_cast %8 : vector<16x8xf32> to vector<2x8x8xf32>
    %10 = vector.extract_strided_slice %7 {offsets = [0, 8], sizes = [16, 8], strides = [1, 1]} : vector<16x32xf32> to vector<16x8xf32>
    %11 = vector.shape_cast %10 : vector<16x8xf32> to vector<2x8x8xf32>
    %12 = vector.extract_strided_slice %7 {offsets = [0, 16], sizes = [16, 8], strides = [1, 1]} : vector<16x32xf32> to vector<16x8xf32>
    %13 = vector.shape_cast %12 : vector<16x8xf32> to vector<2x8x8xf32>
    %14 = vector.extract_strided_slice %7 {offsets = [0, 24], sizes = [16, 8], strides = [1, 1]} : vector<16x32xf32> to vector<16x8xf32>
    %15 = vector.shape_cast %14 : vector<16x8xf32> to vector<2x8x8xf32>
    %16 = tpu.concatenate %9, %11, %13, %15 in 0 : vector<2x8x8xf32>, vector<2x8x8xf32>, vector<2x8x8xf32>, vector<2x8x8xf32> -> vector<8x8x8xf32>
    %17 = arith.truncf %16 : vector<8x8x8xf32> to vector<8x8x8xbf16>
    %18 = vector.extract_strided_slice %6 {offsets = [0, 32], sizes = [16, 32], strides = [1, 1]} : vector<16x96xf32> to vector<16x32xf32>
    %19 = vector.extract_strided_slice %18 {offsets = [0, 0], sizes = [16, 8], strides = [1, 1]} : vector<16x32xf32> to vector<16x8xf32>
    %20 = vector.shape_cast %19 : vector<16x8xf32> to vector<2x8x8xf32>
    %21 = vector.extract_strided_slice %18 {offsets = [0, 8], sizes = [16, 8], strides = [1, 1]} : vector<16x32xf32> to vector<16x8xf32>
    %22 = vector.shape_cast %21 : vector<16x8xf32> to vector<2x8x8xf32>
    %23 = vector.extract_strided_slice %18 {offsets = [0, 16], sizes = [16, 8], strides = [1, 1]} : vector<16x32xf32> to vector<16x8xf32>
    %24 = vector.shape_cast %23 : vector<16x8xf32> to vector<2x8x8xf32>
    %25 = vector.extract_strided_slice %18 {offsets = [0, 24], sizes = [16, 8], strides = [1, 1]} : vector<16x32xf32> to vector<16x8xf32>
    %26 = vector.shape_cast %25 : vector<16x8xf32> to vector<2x8x8xf32>
    %27 = tpu.concatenate %20, %22, %24, %26 in 0 : vector<2x8x8xf32>, vector<2x8x8xf32>, vector<2x8x8xf32>, vector<2x8x8xf32> -> vector<8x8x8xf32>
    %28 = arith.truncf %27 : vector<8x8x8xf32> to vector<8x8x8xbf16>
    %29 = vector.extract_strided_slice %6 {offsets = [0, 64], sizes = [16, 32], strides = [1, 1]} : vector<16x96xf32> to vector<16x32xf32>
    %30 = vector.extract_strided_slice %29 {offsets = [0, 0], sizes = [16, 8], strides = [1, 1]} : vector<16x32xf32> to vector<16x8xf32>
    %31 = vector.shape_cast %30 : vector<16x8xf32> to vector<2x8x8xf32>
    %32 = vector.extract_strided_slice %29 {offsets = [0, 8], sizes = [16, 8], strides = [1, 1]} : vector<16x32xf32> to vector<16x8xf32>
    %33 = vector.shape_cast %32 : vector<16x8xf32> to vector<2x8x8xf32>
    %34 = vector.extract_strided_slice %29 {offsets = [0, 16], sizes = [16, 8], strides = [1, 1]} : vector<16x32xf32> to vector<16x8xf32>
    %35 = vector.shape_cast %34 : vector<16x8xf32> to vector<2x8x8xf32>
    %36 = vector.extract_strided_slice %29 {offsets = [0, 24], sizes = [16, 8], strides = [1, 1]} : vector<16x32xf32> to vector<16x8xf32>
    %37 = vector.shape_cast %36 : vector<16x8xf32> to vector<2x8x8xf32>
    %38 = tpu.concatenate %31, %33, %35, %37 in 0 : vector<2x8x8xf32>, vector<2x8x8xf32>, vector<2x8x8xf32>, vector<2x8x8xf32> -> vector<8x8x8xf32>
    %39 = arith.truncf %38 : vector<8x8x8xf32> to vector<8x8x8xbf16>
    "tpu.trace_start"() <{level = 10 : i32, message = "gqd,gkd->gqk"}> : () -> ()
    %cst_5 = arith.constant dense<0.000000e+00> : vector<8x8x8xf32>
    %40 = tpu.matmul %17, %28, %cst_5 {dimension_numbers = #tpu.dot_dimension_numbers<[2], [2], [1], [1], [0, 0, 0, 1, 1, 1], [0], [0]>} : vector<8x8x8xbf16>, vector<8x8x8xbf16>, vector<8x8x8xf32> -> vector<8x8x8xf32>
    "tpu.trace_stop"() : () -> ()
    %cst_6 = arith.constant dense<0xFF800000> : vector<8x8xf32>
    %41 = vector.multi_reduction <maximumf>, %40, %cst_6 [2] : vector<8x8x8xf32> to vector<8x8xf32>
    %42 = vector.shape_cast %41 : vector<8x8xf32> to vector<8x8x1xf32>
    %43 = vector.broadcast %42 : vector<8x8x1xf32> to vector<8x8x8xf32>
    %44 = arith.subf %40, %43 : vector<8x8x8xf32>
    %45 = math.exp %44 : vector<8x8x8xf32>
    %cst_7 = arith.constant dense<0.000000e+00> : vector<8x8xf32>
    %46 = vector.multi_reduction <add>, %45, %cst_7 [2] : vector<8x8x8xf32> to vector<8x8xf32>
    %47 = vector.shape_cast %46 : vector<8x8xf32> to vector<8x8x1xf32>
    %48 = tpu.reciprocal %47 {approx = true} : vector<8x8x1xf32> -> vector<8x8x1xf32>
    %49 = vector.broadcast %48 : vector<8x8x1xf32> to vector<8x8x8xf32>
    %50 = arith.mulf %45, %49 : vector<8x8x8xf32>
    %c0_8 = arith.constant 0 : index
    %c0_9 = arith.constant 0 : index
    %c0_10 = arith.constant 0 : index
    %51 = vector.load %arg14[%c0_8, %c0_9, %c0_10] : memref<8x8x8xf32, #tpu.memory_space<vmem>>, vector<8x8x8xf32>
    tpu.vector_store %arg14[%c0_8, %c0_9, %c0_10], %50 {strides = array<i32>} : memref<8x8x8xf32, #tpu.memory_space<vmem>>, vector<8x8x8xf32>,
    %52 = arith.truncf %50 : vector<8x8x8xf32> to vector<8x8x8xbf16>
    "tpu.trace_start"() <{level = 10 : i32, message = "gqk,gkd->gqd"}> : () -> ()
    %cst_11 = arith.constant dense<0.000000e+00> : vector<8x8x8xf32>
    %53 = tpu.matmul %52, %39, %cst_11 {dimension_numbers = #tpu.dot_dimension_numbers<[2], [1], [1], [2], [0, 0, 0, 1, 1, 2], [0], [0]>} : vector<8x8x8xbf16>, vector<8x8x8xbf16>, vector<8x8x8xf32> -> vector<8x8x8xf32>
    "tpu.trace_stop"() : () -> ()
    %54 = vector.extract_strided_slice %53 {offsets = [0, 0, 0], sizes = [2, 8, 8], strides = [1, 1, 1]} : vector<8x8x8xf32> to vector<2x8x8xf32>
    %55 = vector.shape_cast %54 : vector<2x8x8xf32> to vector<16x8xf32>
    %56 = vector.extract_strided_slice %53 {offsets = [2, 0, 0], sizes = [2, 8, 8], strides = [1, 1, 1]} : vector<8x8x8xf32> to vector<2x8x8xf32>
    %57 = vector.shape_cast %56 : vector<2x8x8xf32> to vector<16x8xf32>
    %58 = vector.extract_strided_slice %53 {offsets = [4, 0, 0], sizes = [2, 8, 8], strides = [1, 1, 1]} : vector<8x8x8xf32> to vector<2x8x8xf32>
    %59 = vector.shape_cast %58 : vector<2x8x8xf32> to vector<16x8xf32>
    %60 = vector.extract_strided_slice %53 {offsets = [6, 0, 0], sizes = [2, 8, 8], strides = [1, 1, 1]} : vector<8x8x8xf32> to vector<2x8x8xf32>
    %61 = vector.shape_cast %60 : vector<2x8x8xf32> to vector<16x8xf32>
    %62 = tpu.concatenate %55, %57, %59, %61 in 1 : vector<16x8xf32>, vector<16x8xf32>, vector<16x8xf32>, vector<16x8xf32> -> vector<16x32xf32>
    %63 = arith.truncf %62 : vector<16x32xf32> to vector<16x32xbf16>
    %c0_12 = arith.constant 0 : index
    %c0_13 = arith.constant 0 : index
    %64 = vector.load %arg3[%c0_12, %c0_13] : memref<32x32xbf16, #tpu.memory_space<vmem>>, vector<32x32xbf16>
    %cst_14 = arith.constant dense<0.000000e+00> : vector<16x32xf32>
    %65 = tpu.matmul %63, %64, %cst_14 {dimension_numbers = #tpu.dot_dimension_numbers<[1], [0], [0], [1], [0, 0, 1, 1], [], []>} : vector<16x32xbf16>, vector<32x32xbf16>, vector<16x32xf32> -> vector<16x32xf32>
    %c0_15 = arith.constant 0 : index
    %c0_16 = arith.constant 0 : index
    %66 = vector.load %arg4[%c0_15, %c0_16] : memref<1x32xf32, #tpu.memory_space<vmem>>, vector<1x32xf32>
    %67 = vector.broadcast %66 : vector<1x32xf32> to vector<16x32xf32>
    %68 = arith.addf %65, %67 : vector<16x32xf32>
    %69 = arith.addf %0, %68 : vector<16x32xf32>
    %c0_17 = arith.constant 0 : index
    %c0_18 = arith.constant 0 : index
    %70 = vector.load %arg5[%c0_17, %c0_18] : memref<1x32xf32, #tpu.memory_space<vmem>>, vector<1x32xf32>
    %c0_19 = arith.constant 0 : index
    %c0_20 = arith.constant 0 : index
    %71 = vector.load %arg6[%c0_19, %c0_20] : memref<1x32xf32, #tpu.memory_space<vmem>>, vector<1x32xf32>
    %cst_21 = arith.constant dense<0.000000e+00> : vector<16xf32>
    %72 = vector.multi_reduction <add>, %69, %cst_21 [1] : vector<16x32xf32> to vector<16xf32>
    %73 = vector.shape_cast %72 : vector<16xf32> to vector<16x1xf32>
    %cst_22 = arith.constant 3.200000e+01 : f32
    %74 = vector.broadcast %cst_22 : f32 to vector<16x1xf32>
    %75 = arith.divf %73, %74 : vector<16x1xf32>
    %76 = vector.broadcast %75 : vector<16x1xf32> to vector<16x32xf32>
    %77 = arith.subf %69, %76 : vector<16x32xf32>
    %78 = arith.mulf %77, %77 : vector<16x32xf32>
    %cst_23 = arith.constant dense<0.000000e+00> : vector<16xf32>
    %79 = vector.multi_reduction <add>, %78, %cst_23 [1] : vector<16x32xf32> to vector<16xf32>
    %80 = vector.shape_cast %79 : vector<16xf32> to vector<16x1xf32>
    %cst_24 = arith.constant 3.200000e+01 : f32
    %81 = vector.broadcast %cst_24 : f32 to vector<16x1xf32>
    %82 = arith.divf %80, %81 : vector<16x1xf32>
    %83 = vector.broadcast %75 : vector<16x1xf32> to vector<16x32xf32>
    %84 = arith.subf %69, %83 : vector<16x32xf32>
    %cst_25 = arith.constant 9.99999974E-6 : f32
    %85 = vector.broadcast %cst_25 : f32 to vector<16x1xf32>
    %86 = arith.addf %82, %85 : vector<16x1xf32>
    %87 = math.rsqrt %86 : vector<16x1xf32>
    %88 = vector.broadcast %87 : vector<16x1xf32> to vector<16x32xf32>
    %89 = arith.mulf %84, %88 : vector<16x32xf32>
    %90 = vector.broadcast %70 : vector<1x32xf32> to vector<16x32xf32>
    %91 = arith.mulf %89, %90 : vector<16x32xf32>
    %92 = vector.broadcast %71 : vector<1x32xf32> to vector<16x32xf32>
    %93 = arith.addf %91, %92 : vector<16x32xf32>
    %94 = arith.truncf %93 : vector<16x32xf32> to vector<16x32xbf16>
    %c0_26 = arith.constant 0 : index
    %c0_27 = arith.constant 0 : index
    %95 = vector.load %arg7[%c0_26, %c0_27] : memref<32x64xbf16, #tpu.memory_space<vmem>>, vector<32x64xbf16>
    %cst_28 = arith.constant dense<0.000000e+00> : vector<16x64xf32>
    %96 = tpu.matmul %94, %95, %cst_28 {dimension_numbers = #tpu.dot_dimension_numbers<[1], [0], [0], [1], [0, 0, 1, 1], [], []>} : vector<16x32xbf16>, vector<32x64xbf16>, vector<16x64xf32> -> vector<16x64xf32>
    %c0_29 = arith.constant 0 : index
    %c0_30 = arith.constant 0 : index
    %97 = vector.load %arg8[%c0_29, %c0_30] : memref<1x64xf32, #tpu.memory_space<vmem>>, vector<1x64xf32>
    %98 = vector.broadcast %97 : vector<1x64xf32> to vector<16x64xf32>
    %99 = arith.addf %96, %98 : vector<16x64xf32>
    %cst_31 = arith.constant 0.000000e+00 : f32
    %100 = vector.broadcast %cst_31 : f32 to vector<16x64xf32>
    %101 = arith.maximumf %99, %100 : vector<16x64xf32>
    %102 = arith.truncf %101 : vector<16x64xf32> to vector<16x64xbf16>
    %c0_32 = arith.constant 0 : index
    %c0_33 = arith.constant 0 : index
    %103 = vector.load %arg9[%c0_32, %c0_33] : memref<64x32xbf16, #tpu.memory_space<vmem>>, vector<64x32xbf16>
    %cst_34 = arith.constant dense<0.000000e+00> : vector<16x32xf32>
    %104 = tpu.matmul %102, %103, %cst_34 {dimension_numbers = #tpu.dot_dimension_numbers<[1], [0], [0], [1], [0, 0, 1, 1], [], []>} : vector<16x64xbf16>, vector<64x32xbf16>, vector<16x32xf32> -> vector<16x32xf32>
    %c0_35 = arith.constant 0 : index
    %c0_36 = arith.constant 0 : index
    %105 = vector.load %arg10[%c0_35, %c0_36] : memref<1x32xf32, #tpu.memory_space<vmem>>, vector<1x32xf32>
    %106 = vector.broadcast %105 : vector<1x32xf32> to vector<16x32xf32>
    %107 = arith.addf %104, %106 : vector<16x32xf32>
    %108 = arith.addf %93, %107 : vector<16x32xf32>
    %c0_37 = arith.constant 0 : index
    %c0_38 = arith.constant 0 : index
    %109 = vector.load %arg11[%c0_37, %c0_38] : memref<1x32xf32, #tpu.memory_space<vmem>>, vector<1x32xf32>
    %c0_39 = arith.constant 0 : index
    %c0_40 = arith.constant 0 : index
    %110 = vector.load %arg12[%c0_39, %c0_40] : memref<1x32xf32, #tpu.memory_space<vmem>>, vector<1x32xf32>
    %cst_41 = arith.constant dense<0.000000e+00> : vector<16xf32>
    %111 = vector.multi_reduction <add>, %108, %cst_41 [1] : vector<16x32xf32> to vector<16xf32>
    %112 = vector.shape_cast %111 : vector<16xf32> to vector<16x1xf32>
    %cst_42 = arith.constant 3.200000e+01 : f32
    %113 = vector.broadcast %cst_42 : f32 to vector<16x1xf32>
    %114 = arith.divf %112, %113 : vector<16x1xf32>
    %115 = vector.broadcast %114 : vector<16x1xf32> to vector<16x32xf32>
    %116 = arith.subf %108, %115 : vector<16x32xf32>
    %117 = arith.mulf %116, %116 : vector<16x32xf32>
    %cst_43 = arith.constant dense<0.000000e+00> : vector<16xf32>
    %118 = vector.multi_reduction <add>, %117, %cst_43 [1] : vector<16x32xf32> to vector<16xf32>
    %119 = vector.shape_cast %118 : vector<16xf32> to vector<16x1xf32>
    %cst_44 = arith.constant 3.200000e+01 : f32
    %120 = vector.broadcast %cst_44 : f32 to vector<16x1xf32>
    %121 = arith.divf %119, %120 : vector<16x1xf32>
    %122 = vector.broadcast %114 : vector<16x1xf32> to vector<16x32xf32>
    %123 = arith.subf %108, %122 : vector<16x32xf32>
    %cst_45 = arith.constant 9.99999974E-6 : f32
    %124 = vector.broadcast %cst_45 : f32 to vector<16x1xf32>
    %125 = arith.addf %121, %124 : vector<16x1xf32>
    %126 = math.rsqrt %125 : vector<16x1xf32>
    %127 = vector.broadcast %126 : vector<16x1xf32> to vector<16x32xf32>
    %128 = arith.mulf %123, %127 : vector<16x32xf32>
    %129 = vector.broadcast %109 : vector<1x32xf32> to vector<16x32xf32>
    %130 = arith.mulf %128, %129 : vector<16x32xf32>
    %131 = vector.broadcast %110 : vector<1x32xf32> to vector<16x32xf32>
    %132 = arith.addf %130, %131 : vector<16x32xf32>
    %c0_46 = arith.constant 0 : index
    %c0_47 = arith.constant 0 : index
    %133 = vector.load %arg13[%c0_46, %c0_47] : memref<16x32xf32, #tpu.memory_space<vmem>>, vector<16x32xf32>
    tpu.vector_store %arg13[%c0_46, %c0_47], %132 {strides = array<i32>} : memref<16x32xf32, #tpu.memory_space<vmem>>, vector<16x32xf32>,
    return
  }
}

</mosaic_0001>

<bundles_post_ra>
// kernel: transformer_encoder.1
= control target key start
LH: loop header
LB: loop body
LE: loop exit
PB: predicated region body
PF: predicated region fallthrough
CT: control target
= control target key end

     0   :  { %20 = vsyncpa [#allocation3], 0  ;;  %s2190_s0 = inlined_call_operand.vmem [shape: f32[16,32], index: 0, kind: input, shape index: {}]   ;;  %s2191_s1 = inlined_call_operand.vmem [shape: bf16[32,96], index: 1, kind: input, shape index: {}]   ;;  %s2192_s2 = inlined_call_operand.vmem [shape: f32[1,96], index: 2, kind: input, shape index: {}]   ;;  %s2193_s3 = inlined_call_operand.vmem [shape: bf16[32,32], index: 3, kind: input, shape index: {}]   ;;  %s2194_s4 = inlined_call_operand.vmem [shape: f32[1,32], index: 4, kind: input, shape index: {}]   ;;  %s2195_s5 = inlined_call_operand.vmem [shape: f32[1,32], index: 5, kind: input, shape index: {}]   ;;  %s2196_s6 = inlined_call_operand.vmem [shape: f32[1,32], index: 6, kind: input, shape index: {}]   ;;  %s2197_s7 = inlined_call_operand.hbm [shape: bf16[32,64], index: 7, kind: input, shape index: {}]   ;;  %s2198_s8 = inlined_call_operand.vmem [shape: f32[1,64], index: 8, kind: input, shape index: {}]   ;;  %s2199_s9 = inlined_call_operand.vmem [shape: bf16[64,32], index: 9, kind: input, shape index: {}]   ;;  %s2200_s10 = inlined_call_operand.vmem [shape: f32[1,32], index: 10, kind: input, shape index: {}]   ;;  %s2201_s11 = inlined_call_operand.vmem [shape: f32[1,32], index: 11, kind: input, shape index: {}]   ;;  %s2202_s12 = inlined_call_operand.vmem [shape: f32[1,32], index: 12, kind: input, shape index: {}]   ;;  %s2203_s13 = inlined_call_operand.hbm [shape: f32[16,32], index: 13, kind: output, shape index: {0}]   ;;  %s2204_s14 = inlined_call_operand.vmem [shape: f32[8,8,8], index: 14, kind: output, shape index: {1}]  }
   0x1   :  { %21 = vsyncpa [#allocation4], 0  ;;  %s1772_s29 = smov [#allocation2]   ;;  %s1724_s17 = scalar_lea.hbm %s2197_s7, 256 }
   0x2   :  { %s41_s30 = sshll.u32 %s1772_s29, 4  ;;  %p1725_p0 = scmp.ne.s32.totalorder %s2197_s7, %s1724_s17  ;;  %s42_s30 = int_to_ptr.vmem [resolvable:$true] %s41_s30 }
   0x3   :  { %p1728_p1 = scmp.lt.u32.totalorder %s1724_s17, %s2197_s7 }
   0x5   :  { %p1730_p2 = pnand %p1728_p1, %p1725_p0 }
   0x7   :  { %1733 = shalt.err (!%p1730_p2)
}
   0x8   :  { %s1734_s22 = scalar_lea.vmem %s42_s30, 256  ;;  %p1739_p4 = scmp.lt.s32.totalorder %s42_s30, %s42_s30 }
   0x9   :  { %p1735_p3 = scmp.ne.s32.totalorder %s42_s30, %s1734_s22  ;;  %p1740_p5 = scmp.lt.s32.totalorder %s1734_s22, %s1734_s22 }
   0xb   :  { %p1741_p6 = por %p1740_p5, %p1739_p4 }
   0xd   :  { %p1742_p7 = pnand %p1741_p6, %p1735_p3 }
   0xf   :  { %1745 = shalt.err (!%p1742_p7)
}
  0x10   :  { %s1773_s23 = smov 64   ;;  %s1774_s24 = smov 4  }
  0x11   :  { %47 = dma.hbm_to_vmem [thread:$0]  %s2197_s7, 256, %s42_s30, [#allocation3], %s1773_s23, %s1773_s23, %s1774_s24  }
  0x12   :  { %1768 = dma.done.wait [#allocation3], 256  }
  0x13   :  { %1769 = vsyncadd [#allocation3], 4294967040  ;;  %v1775_v0 = vmov 0.0   ;;  %vm1776_vm0 = vmmov 0   ;;  %v1674_v1 = vld [vmem:[%s2191_s1] sm:$0xff]   ;;  %v1675_v2 = vld [vmem:[%s2191_s1 + $0x8] sm:$0xff]  }
  0x14   :  { %1498 = vmatprep.subr.bf16.mxu0 %v1775_v0  ;;  %1502 = vmatprep.mubr.msk.bf16.mxu0 %vm1776_vm0, %v1775_v0  ;;  %v1890_v3 = vld [vmem:[%s2190_s0] sm:$0xff]  ;;  %v1895_v4 = vld [vmem:[%s2190_s0 + $0x8] sm:$0xff]  ;;  %vm88_vm1 = vcmask 261120   ;;  %s1777_s0 = smov 104   ;;  %s1778_s19 = smov 120   ;;  %vm164_vm2 = vcmask 64512  }
  0x15   :  { %1506 = vmatprep.subr.bf16.mxu1 %v1775_v0  ;;  %1508 = vmatprep.mubr.msk.bf16.mxu1 %vm1776_vm0, %v1775_v0  ;;  %v64_v5 = vpack.c.bf16 %v1895_v4, %v1890_v3  ;;  %v1414_v6 = vld [vmem:[%s2192_s2] ss:$0 sm:$0xff]  ;;  %s1779_s20 = smov 96   ;;  %s1780_s21 = smov 112   ;;  %vm663_vm3 = vcmask 1043456   ;;  %vm1069_vm4 = vcmask 130048  }
  0x16   :  { %1499 = vmatpush3.bf16.msra.mxu0 %v1674_v1  ;;  %s1782_s2 = smov 16   ;;  %s1783_s22 = smov 24   ;;  %vm1072_vm5 = vcmask 195584   ;;  %vm1300_vm6 = vcmask 523264  }
  0x17   :  { %1500 = vmatprep.subr.bf16.mxu0 %v1775_v0 }
  0x1a   :  { %1501 = vmatpush3.bf16.msra.mxu0 %v1675_v2 }
  0x1b   :  { %1512 = vmatprep.subr.bf16.mxu0 %v1775_v0 }
  0x1d   :  { %1503 = vmatmul.mubr.msk.bf16.vlgmr.msra.gmra.mrb[0].mxu0 %vm88_vm1, %v64_v5 }
  0x1e   :  { %1514 = vmatprep.mubr.msk.bf16.mxu0 %vm1776_vm0, %v1775_v0 }
  0xf0   :  { %v126_v7 = vpop.f32.mrb[0].mxu0 }
  0xf1   :  { %v1504_v8 = vpop.f32.mrb[1].mxu0  ;;  %v127_v10 = vadd.f32 %v1414_v6, %v126_v7 }
  0xf2   :  { %v129_v9 = vpop.f32.mrb[2].mxu0 }
  0xf3   :  { %v130_v11 = vadd.f32 %v1414_v6, %v129_v9  ;;  %v1505_v12 = vpop.f32.mrb[3].mxu0  ;;  %v153_v14 = vpack.c.bf16 %v127_v10, %v127_v10 }
  0xf5   :  { %v1654_v13 = vpack.i.bf16 %v130_v11, %v127_v10  ;;  %v154_v15 = vpack.c.bf16 %v130_v11, %v130_v11 }
  0xf7   :  { %1655 = vrot.lane.b32.xlu1 %v1654_v13, %s1777_s0  ;;  %1645 = vrot.lane.b32.xlu0 %v1654_v13, %s1778_s19  ;;  %s1784_s19 = smov [#allocation5]  }
  0xfb   :  { %162 = vrot.lane.b32.xlu1 %v153_v14, %s1779_s20  ;;  %1650 = vrot.lane.b32.xlu0 %v1654_v13, %s1780_s21 }
  0xff   :  { %212 = vrot.lane.b32.xlu0 %v154_v15, %s1779_s20 }
 0x169   :  { %v1656_v16 = vpop.permute.xlu1 %1655  ;;  %v1646_v17 = vpop.permute.xlu0 %1645 }
 0x16a   :  { %v1648_v18 = vunpack.i.h.bf16 %v1646_v17  ;;  %v1647_v19 = vunpack.i.l.bf16 %v1646_v17  ;;  %v1657_v27 = vunpack.i.l.bf16 %v1656_v16  ;;  %v1658_v30 = vunpack.i.h.bf16 %v1656_v16 }
 0x16c   :  { %v1909_v20 = vpack.c.bf16 %v1648_v18, %v1648_v18  ;;  %v1911_v21 = vpack.c.bf16 %v1647_v19, %v1647_v19  ;;  %v1928_v33 = vpack.c.bf16 %v1657_v27, %v1657_v27  ;;  %v1931_v34 = vpack.c.bf16 %v1658_v30, %v1658_v30 }
 0x16d   :  { %v163_v22 = vpop.permute.xlu1 %162  ;;  %v1651_v23 = vpop.permute.xlu0 %1650 }
 0x16e   :  { %v1653_v24 = vunpack.i.h.bf16 %v1651_v23  ;;  %v1652_v25 = vunpack.i.l.bf16 %v1651_v23  ;;  %261 = vrot.lane.b32.xlu1 %v1911_v21, %s1779_s20  ;;  %310 = vrot.lane.b32.xlu0 %v1909_v20, %s1779_s20  ;;  %v169_v26 = vsel %vm164_vm2, %v163_v22, 0 }
 0x16f   :  { %1507 = vmatpush3.bf16.xpose.msra.mxu1 %v169_v26 }
 0x170   :  { %v1918_v28 = vpack.c.bf16 %v1653_v24, %v1653_v24  ;;  %v1920_v29 = vpack.c.bf16 %v1652_v25, %v1652_v25  ;;  %1518 = vmatprep.subr.bf16.mxu1 %v1775_v0 }
 0x171   :  { %v213_v31 = vpop.permute.xlu0 %212 }
 0x172   :  { %v218_v32 = vsel %vm164_vm2, %v213_v31, 0  ;;  %359 = vrot.lane.b32.xlu1 %v1920_v29, %s1779_s20  ;;  %408 = vrot.lane.b32.xlu0 %v1918_v28, %s1779_s20 }
 0x173   :  { %1513 = vmatpush3.bf16.xpose.msra.mxu0 %v218_v32 }
 0x174   :  { %1524 = vmatprep.subr.bf16.mxu0 %v1775_v0 }
 0x176   :  { %1509 = vmatmul.mubr.msk.bf16.vlgmr.msra.gmra.mrb[0].mxu1 %vm164_vm2, %v153_v14  ;;  %457 = vrot.lane.b32.xlu1 %v1928_v33, %s1779_s20 }
 0x177   :  { %506 = vrot.lane.b32.xlu0 %v1931_v34, %s1779_s20  ;;  %1520 = vmatprep.mubr.msk.bf16.mxu1 %vm1776_vm0, %v1775_v0  ;;  %s1398_s20 = sshll.u32 %s1784_s19, 4  ;;  %s1399_s20 = int_to_ptr.vmem [resolvable:$true] %s1398_s20 }
 0x178   :  { %s1746_s21 = scalar_lea.vmem %s1399_s20, 256  ;;  %p1751_p9 = scmp.lt.s32.totalorder %s1399_s20, %s1399_s20 }
 0x179   :  { %p1747_p8 = scmp.ne.s32.totalorder %s1399_s20, %s1746_s21  ;;  %p1752_p10 = scmp.lt.s32.totalorder %s1746_s21, %s1746_s21 }
 0x17a   :  { %707 = vrot.lane.b32.xlu1 %v154_v15, %s1773_s23  ;;  %1515 = vmatmul.mubr.msk.bf16.vlgmr.msra.gmra.mrb[4].mxu0 %vm164_vm2, %v154_v15 }
 0x17b   :  { %658 = vrot.lane.b32.xlu0 %v153_v14, %s1773_s23  ;;  %1526 = vmatprep.mubr.msk.bf16.mxu0 %vm1776_vm0, %v1775_v0  ;;  %p1753_p11 = por %p1752_p10, %p1751_p9 }
 0x17d   :  { %p1754_p12 = pnand %p1753_p11, %p1747_p8 }
 0x1e0   :  { %v262_v35 = vpop.permute.xlu1 %261  ;;  %v311_v36 = vpop.permute.xlu0 %310 }
 0x1e1   :  { %v267_v37 = vsel %vm164_vm2, %v262_v35, 0  ;;  %v316_v38 = vsel %vm164_vm2, %v311_v36, 0 }
 0x1e2   :  { %1519 = vmatpush3.bf16.xpose.msra.mxu1 %v267_v37  ;;  %1525 = vmatpush3.bf16.xpose.msra.mxu0 %v316_v38 }
 0x1e3   :  { %1530 = vmatprep.subr.bf16.mxu1 %v1775_v0  ;;  %1536 = vmatprep.subr.bf16.mxu0 %v1775_v0 }
 0x1e4   :  { %v360_v39 = vpop.permute.xlu1 %359  ;;  %v409_v40 = vpop.permute.xlu0 %408 }
 0x1e5   :  { %v365_v41 = vsel %vm164_vm2, %v360_v39, 0  ;;  %v414_v42 = vsel %vm164_vm2, %v409_v40, 0 }
 0x1e8   :  { %v458_v43 = vpop.permute.xlu1 %457 }
 0x1e9   :  { %1521 = vmatmul.mubr.msk.bf16.vlgmr.msra.gmra.mrb[4].mxu1 %vm164_vm2, %v1911_v21  ;;  %1527 = vmatmul.mubr.msk.bf16.vlgmr.msra.gmra.mrb[8].mxu0 %vm164_vm2, %v1909_v20  ;;  %v507_v44 = vpop.permute.xlu0 %506  ;;  %v463_v45 = vsel %vm164_vm2, %v458_v43, 0 }
 0x1ea   :  { %1531 = vmatpush3.bf16.xpose.msra.mxu1 %v365_v41  ;;  %1537 = vmatpush3.bf16.xpose.msra.mxu0 %v414_v42  ;;  %v512_v46 = vsel %vm164_vm2, %v507_v44, 0 }
 0x1eb   :  { %1532 = vmatprep.mubr.msk.bf16.mxu1 %vm1776_vm0, %v1775_v0  ;;  %1538 = vmatprep.mubr.msk.bf16.mxu0 %vm1776_vm0, %v1775_v0 }
 0x1ec   :  { %1542 = vmatprep.subr.bf16.mxu1 %v1775_v0  ;;  %1548 = vmatprep.subr.bf16.mxu0 %v1775_v0  ;;  %v708_v47 = vpop.permute.xlu1 %707 }
 0x1ed   :  { %v659_v48 = vpop.permute.xlu0 %658  ;;  %v713_v49 = vsel %vm663_vm3, %v708_v47, 0 }
 0x1ee   :  { %v665_v50 = vsel %vm663_vm3, %v659_v48, 0 }
 0x1f1   :  { %1533 = vmatmul.mubr.msk.bf16.vlgmr.msra.gmra.mrb[8].mxu1 %vm164_vm2, %v1920_v29  ;;  %1539 = vmatmul.mubr.msk.bf16.vlgmr.msra.gmra.mrb[12].mxu0 %vm164_vm2, %v1918_v28 }
 0x1f2   :  { %1543 = vmatpush3.bf16.xpose.msra.mxu1 %v463_v45  ;;  %1549 = vmatpush3.bf16.xpose.msra.mxu0 %v512_v46 }
 0x1f3   :  { %1544 = vmatprep.mubr.msk.bf16.mxu1 %vm1776_vm0, %v1775_v0  ;;  %1550 = vmatprep.mubr.msk.bf16.mxu0 %vm1776_vm0, %v1775_v0 }
 0x1f4   :  { %1554 = vmatprep.subr.bf16.mxu1 %v1775_v0  ;;  %1560 = vmatprep.subr.bf16.mxu0 %v1775_v0 }
 0x1f9   :  { %1545 = vmatmul.mubr.msk.bf16.vlgmr.msra.gmra.mrb[12].mxu1 %vm164_vm2, %v1928_v33  ;;  %1551 = vmatmul.mubr.msk.bf16.vlgmr.msra.gmra.mrb[16].mxu0 %vm164_vm2, %v1931_v34 }
 0x1fa   :  { %1555 = vmatpush3.bf16.msra.mxu1 %v665_v50  ;;  %1561 = vmatpush3.bf16.msra.mxu0 %v713_v49 }
 0x1fb   :  { %1556 = vmatprep.mubr.msk.bf16.mxu1 %vm1776_vm0, %v1775_v0  ;;  %1562 = vmatprep.mubr.msk.bf16.mxu0 %vm1776_vm0, %v1775_v0 }
 0x1fc   :  { %1566 = vmatprep.subr.bf16.mxu1 %v1775_v0  ;;  %1572 = vmatprep.subr.bf16.mxu0 %v1775_v0 }
 0x249   :  { %v205_v51 = vpop.f32.mrb[0].mxu1 }
 0x24a   :  { %v1510_v52 = vpop.f32.mrb[1].mxu1  ;;  %v554_v53 = vsel %vm164_vm2, %v205_v51, -inf }
 0x24b   :  { %v208_v54 = vpop.f32.mrb[2].mxu1  ;;  %555 = vmax.xlane.f32.xlu1 %v554_v53 }
 0x24c   :  { %v1511_v55 = vpop.f32.mrb[3].mxu1 }
 0x24d   :  { %v254_v56 = vpop.f32.mrb[4].mxu0 }
 0x24e   :  { %v1516_v57 = vpop.f32.mrb[5].mxu0  ;;  %v557_v58 = vsel %vm164_vm2, %v254_v56, -inf }
 0x24f   :  { %558 = vmax.xlane.f32.xlu0 %v557_v58  ;;  %v257_v59 = vpop.f32.mrb[6].mxu0 }
 0x250   :  { %v1517_v60 = vpop.f32.mrb[7].mxu0 }
 0x2bc   :  { %v303_v61 = vpop.f32.mrb[4].mxu1  ;;  %v352_v62 = vpop.f32.mrb[8].mxu0 }
 0x2bd   :  { %v1522_v63 = vpop.f32.mrb[5].mxu1  ;;  %v1528_v1 = vpop.f32.mrb[9].mxu0  ;;  %v560_v2 = vsel %vm164_vm2, %v303_v61, -inf  ;;  %v563_v5 = vsel %vm164_vm2, %v352_v62, -inf }
 0x2be   :  { %v306_v6 = vpop.f32.mrb[6].mxu1  ;;  %561 = vmax.xlane.f32.xlu0 %v560_v2  ;;  %564 = vmax.xlane.f32.xlu1 %v563_v5  ;;  %v355_v7 = vpop.f32.mrb[10].mxu0 }
 0x2bf   :  { %v1523_v8 = vpop.f32.mrb[7].mxu1  ;;  %v1529_v9 = vpop.f32.mrb[11].mxu0 }
 0x2c4   :  { %v1989_v10 = vpop.f32.mrb[8].mxu1  ;;  %v450_v11 = vpop.f32.mrb[12].mxu0 }
 0x2c5   :  { %v1534_v12 = vpop.f32.mrb[9].mxu1  ;;  %v1540_v13 = vpop.f32.mrb[13].mxu0  ;;  %v566_v14 = vsel %vm164_vm2, %v1989_v10, -inf  ;;  %v569_v15 = vsel %vm164_vm2, %v450_v11, -inf }
 0x2c6   :  { %v404_v16 = vpop.f32.mrb[10].mxu1  ;;  %567 = vmax.xlane.f32.xlu0 %v566_v14  ;;  %570 = vmax.xlane.f32.xlu1 %v569_v15  ;;  %v453_v17 = vpop.f32.mrb[14].mxu0 }
 0x2c7   :  { %v1535_v18 = vpop.f32.mrb[11].mxu1  ;;  %v1541_v19 = vpop.f32.mrb[15].mxu0 }
 0x2cc   :  { %v1994_v22 = vpop.f32.mrb[12].mxu1  ;;  %v548_v23 = vpop.f32.mrb[16].mxu0 }
 0x2cd   :  { %v1546_v24 = vpop.f32.mrb[13].mxu1  ;;  %v1552_v25 = vpop.f32.mrb[17].mxu0  ;;  %v572_v26 = vsel %vm164_vm2, %v1994_v22, -inf  ;;  %v575_v27 = vsel %vm164_vm2, %v548_v23, -inf }
 0x2ce   :  { %v502_v30 = vpop.f32.mrb[14].mxu1  ;;  %573 = vmax.xlane.f32.xlu0 %v572_v26  ;;  %576 = vmax.xlane.f32.xlu1 %v575_v27  ;;  %v551_v31 = vpop.f32.mrb[18].mxu0 }
 0x2cf   :  { %v1547_v32 = vpop.f32.mrb[15].mxu1  ;;  %v1553_v35 = vpop.f32.mrb[19].mxu0 }
 0x2d8   :  { %v556_v36 = vpop.xlane.xlu1 %555 }
 0x2d9   :  { %v578_v38 = vsub.f32 %v205_v51, %v556_v36 }
 0x2db   :  { %v586_v40 = vmul.f32 1.442695, %v578_v38 }
 0x2dc   :  { %v559_v37 = vpop.xlane.xlu0 %558 }
 0x2dd   :  { %v579_v39 = vsub.f32 %v254_v56, %v559_v37  ;;  %1684 = vpow2.f32 %v586_v40 }
 0x2df   :  { %755 = vrot.lane.b32.xlu1 %v1911_v21, %s1773_s23  ;;  %v588_v41 = vmul.f32 1.442695, %v579_v39 }
 0x2e1   :  { %1686 = vpow2.f32 %v588_v41 }
 0x2e4   :  { %803 = vrot.lane.b32.xlu0 %v1909_v20, %s1773_s23 }
 0x2e7   :  { %v1685_v42 = vpop.eup %1684 }
 0x2e8   :  { %v602_v44 = vsel %vm164_vm2, %v1685_v42, 0.0 }
 0x2eb   :  { %v1687_v43 = vpop.eup %1686 }
 0x2ec   :  { %v605_v45 = vsel %vm164_vm2, %v1687_v43, 0.0 }
 0x303   :  { %603 = vadd.xlane.f32.xlu0 %v602_v44  ;;  %606 = vadd.xlane.f32.xlu1 %v605_v45 }
 0x314   :  { %851 = vrot.lane.b32.xlu1 %v1920_v29, %s1773_s23 }
 0x34b   :  { %v562_v20 = vpop.xlane.xlu0 %561  ;;  %v565_v21 = vpop.xlane.xlu1 %564 }
 0x34c   :  { %v580_v46 = vsub.f32 %v303_v61, %v562_v20  ;;  %v581_v47 = vsub.f32 %v352_v62, %v565_v21 }
 0x34e   :  { %v590_v48 = vmul.f32 1.442695, %v580_v46  ;;  %v592_v49 = vmul.f32 1.442695, %v581_v47 }
 0x350   :  { %1688 = vpow2.f32 %v590_v48 }
 0x351   :  { %1690 = vpow2.f32 %v592_v49 }
 0x353   :  { %v571_v50 = vpop.xlane.xlu1 %570  ;;  %v568_v63 = vpop.xlane.xlu0 %567 }
 0x354   :  { %v583_v51 = vsub.f32 %v450_v11, %v571_v50  ;;  %v582_v1 = vsub.f32 %v1989_v10, %v568_v63 }
 0x356   :  { %v596_v52 = vmul.f32 1.442695, %v583_v51  ;;  %v594_v5 = vmul.f32 1.442695, %v582_v1 }
 0x358   :  { %1692 = vpow2.f32 %v596_v52 }
 0x35a   :  { %v2007_v53 = vpop.eup %1688 }
 0x35b   :  { %v2009_v54 = vpop.eup %1690  ;;  %v577_v55 = vpop.xlane.xlu1 %576  ;;  %v608_v29 = vsel %vm164_vm2, %v2007_v53, 0.0 }
 0x35c   :  { %v585_v56 = vsub.f32 %v548_v23, %v577_v55  ;;  %609 = vadd.xlane.f32.xlu0 %v608_v29  ;;  %v611_v57 = vsel %vm164_vm2, %v2009_v54, 0.0  ;;  %v574_v2 = vpop.xlane.xlu0 %573 }
 0x35d   :  { %612 = vadd.xlane.f32.xlu1 %v611_v57  ;;  %v584_v6 = vsub.f32 %v1994_v22, %v574_v2 }
 0x35e   :  { %v600_v58 = vmul.f32 1.442695, %v585_v56 }
 0x35f   :  { %v598_v7 = vmul.f32 1.442695, %v584_v6  ;;  %v756_v9 = vpop.permute.xlu1 %755 }
 0x360   :  { %1694 = vpow2.f32 %v600_v58  ;;  %v804_v8 = vpop.permute.xlu0 %803  ;;  %v761_v22 = vsel %vm663_vm3, %v756_v9, 0 }
 0x361   :  { %1696 = vpow2.f32 %v594_v5  ;;  %v809_v23 = vsel %vm663_vm3, %v804_v8, 0 }
 0x362   :  { %v2015_v59 = vpop.eup %1692  ;;  %1698 = vpow2.f32 %v598_v7 }
 0x363   :  { %v617_v60 = vsel %vm164_vm2, %v2015_v59, 0.0 }
 0x364   :  { %618 = vadd.xlane.f32.xlu1 %v617_v60 }
 0x36a   :  { %v2019_v61 = vpop.eup %1694 }
 0x36b   :  { %v623_v62 = vsel %vm164_vm2, %v2019_v61, 0.0  ;;  %v2029_v11 = vpop.eup %1696 }
 0x36c   :  { %624 = vadd.xlane.f32.xlu1 %v623_v62  ;;  %v2033_v10 = vpop.eup %1698 }
 0x372   :  { %899 = vrot.lane.b32.xlu0 %v1918_v28, %s1773_s23  ;;  %v614_v28 = vsel %vm164_vm2, %v2029_v11, 0.0 }
 0x37d   :  { %947 = vrot.lane.b32.xlu1 %v1928_v33, %s1773_s23  ;;  %v620_v33 = vsel %vm164_vm2, %v2033_v10, 0.0 }
 0x390   :  { %v604_v12 = vpop.xlane.xlu0 %603  ;;  %v607_v13 = vpop.xlane.xlu1 %606 }
 0x391   :  { %1700 = vrcp.f32 %v604_v12  ;;  %615 = vadd.xlane.f32.xlu0 %v614_v28 }
 0x392   :  { %1702 = vrcp.f32 %v607_v13 }
 0x394   :  { %v852_v24 = vpop.permute.xlu1 %851 }
 0x395   :  { %621 = vadd.xlane.f32.xlu0 %v620_v33  ;;  %v857_v38 = vsel %vm663_vm3, %v852_v24, 0 }
 0x39b   :  { %v1701_v14 = vpop.eup %1700 }
 0x39c   :  { %v1703_v15 = vpop.eup %1702  ;;  %v634_v16 = vmul.f32 %v1701_v14, %v1685_v42  ;;  %v1676_v14 = vld [vmem:[%s2193_s3] sm:$0xff]  }
 0x39d   :  { %v635_v17 = vmul.f32 %v1703_v15, %v1687_v43 }
 0x39e   :  { %642 = vst.msk [vmem:[%s2204_s14] sm:$0xff] %vm164_vm2, %v634_v16  ;;  %v650_v18 = vpack.c.bf16 %v634_v16, %v634_v16 }
 0x39f   :  { %643 = vst.msk [vmem:[%s2204_s14 + $0x8] sm:$0xff] %vm164_vm2, %v635_v17  ;;  %v651_v19 = vpack.c.bf16 %v635_v17, %v635_v17 }
 0x3a0   :  { %1557 = vmatmul.mubr.msk.bf16.vlgmr.msra.gmra.mrb[16].mxu1 %vm164_vm2, %v650_v18 }
 0x3a1   :  { %1563 = vmatmul.mubr.msk.bf16.vlgmr.msra.gmra.mrb[20].mxu0 %vm164_vm2, %v651_v19  ;;  %1567 = vmatpush3.bf16.msra.mxu1 %v761_v22  ;;  %v1677_v22 = vld [vmem:[%s2193_s3 + $0x8] sm:$0xff]  }
 0x3a2   :  { %1573 = vmatpush3.bf16.msra.mxu0 %v809_v23  ;;  %1568 = vmatprep.mubr.msk.bf16.mxu1 %vm1776_vm0, %v1775_v0 }
 0x3a3   :  { %1574 = vmatprep.mubr.msk.bf16.mxu0 %vm1776_vm0, %v1775_v0  ;;  %1578 = vmatprep.subr.bf16.mxu1 %v1775_v0 }
 0x3a4   :  { %1584 = vmatprep.subr.bf16.mxu0 %v1775_v0 }
 0x3ab   :  { %995 = vrot.lane.b32.xlu0 %v1931_v34, %s1773_s23 }
 0x3e9   :  { %v610_v25 = vpop.xlane.xlu0 %609 }
 0x3ea   :  { %1704 = vrcp.f32 %v610_v25  ;;  %v613_v26 = vpop.xlane.xlu1 %612 }
 0x3eb   :  { %1706 = vrcp.f32 %v613_v26 }
 0x3ed   :  { %v900_v36 = vpop.permute.xlu0 %899 }
 0x3ee   :  { %v905_v39 = vsel %vm663_vm3, %v900_v36, 0 }
 0x3f1   :  { %v619_v27 = vpop.xlane.xlu1 %618 }
 0x3f2   :  { %1708 = vrcp.f32 %v619_v27 }
 0x3f4   :  { %v1705_v30 = vpop.eup %1704 }
 0x3f5   :  { %v1707_v31 = vpop.eup %1706  ;;  %v636_v32 = vmul.f32 %v1705_v30, %v2007_v53 }
 0x3f6   :  { %v637_v35 = vmul.f32 %v1707_v31, %v2009_v54 }
 0x3f7   :  { %644 = vst.msk [vmem:[%s2204_s14 + $0x10] sm:$0xff] %vm164_vm2, %v636_v32  ;;  %v652_v34 = vpack.c.bf16 %v636_v32, %v636_v32 }
 0x3f8   :  { %645 = vst.msk [vmem:[%s2204_s14 + $0x18] sm:$0xff] %vm164_vm2, %v637_v35  ;;  %v653_v37 = vpack.c.bf16 %v637_v35, %v637_v35 }
 0x3f9   :  { %1569 = vmatmul.mubr.msk.bf16.vlgmr.msra.gmra.mrb[20].mxu1 %vm164_vm2, %v652_v34  ;;  %v625_v40 = vpop.xlane.xlu1 %624 }
 0x3fa   :  { %1575 = vmatmul.mubr.msk.bf16.vlgmr.msra.gmra.mrb[24].mxu0 %vm164_vm2, %v653_v37  ;;  %1579 = vmatpush3.bf16.msra.mxu1 %v857_v38  ;;  %1710 = vrcp.f32 %v625_v40 }
 0x3fb   :  { %1585 = vmatpush3.bf16.msra.mxu0 %v905_v39  ;;  %1586 = vmatprep.mubr.msk.bf16.mxu0 %vm1776_vm0, %v1775_v0 }
 0x3fc   :  { %1596 = vmatprep.subr.bf16.mxu0 %v1775_v0  ;;  %1580 = vmatprep.mubr.msk.bf16.mxu1 %vm1776_vm0, %v1775_v0  ;;  %v1709_v41 = vpop.eup %1708 }
 0x3fd   :  { %1590 = vmatprep.subr.bf16.mxu1 %v1775_v0  ;;  %v639_v42 = vmul.f32 %v1709_v41, %v2015_v59  ;;  %v948_v51 = vpop.permute.xlu1 %947 }
 0x3fe   :  { %v953_v54 = vsel %vm663_vm3, %v948_v51, 0 }
 0x3ff   :  { %647 = vst.msk [vmem:[%s2204_s14 + $0x28] sm:$0xff] %vm164_vm2, %v639_v42  ;;  %v655_v43 = vpack.c.bf16 %v639_v42, %v639_v42 }
 0x402   :  { %1587 = vmatmul.mubr.msk.bf16.vlgmr.msra.gmra.mrb[28].mxu0 %vm164_vm2, %v655_v43 }
 0x403   :  { %1598 = vmatprep.mubr.msk.bf16.mxu0 %vm1776_vm0, %v1775_v0 }
 0x404   :  { %v1711_v44 = vpop.eup %1710 }
 0x405   :  { %v641_v45 = vmul.f32 %v1711_v44, %v2019_v61 }
 0x407   :  { %649 = vst.msk [vmem:[%s2204_s14 + $0x38] sm:$0xff] %vm164_vm2, %v641_v45  ;;  %v657_v49 = vpack.c.bf16 %v641_v45, %v641_v45 }
 0x41e   :  { %v616_v20 = vpop.xlane.xlu0 %615 }
 0x41f   :  { %1712 = vrcp.f32 %v616_v20 }
 0x422   :  { %v622_v21 = vpop.xlane.xlu0 %621 }
 0x423   :  { %1714 = vrcp.f32 %v622_v21 }
 0x426   :  { %v996_v46 = vpop.permute.xlu0 %995 }
 0x427   :  { %v1001_v47 = vsel %vm663_vm3, %v996_v46, 0 }
 0x428   :  { %1597 = vmatpush3.bf16.msra.mxu0 %v1001_v47 }
 0x429   :  { %v1713_v48 = vpop.eup %1712  ;;  %1610 = vmatprep.subr.bf16.mxu0 %v1775_v0 }
 0x42a   :  { %v638_v50 = vmul.f32 %v1713_v48, %v2029_v11 }
 0x42b   :  { %1599 = vmatmul.mubr.msk.bf16.vlgmr.msra.gmra.mrb[32].mxu0 %vm164_vm2, %v657_v49  ;;  %v1434_v49 = vld [vmem:[%s2194_s4] ss:$0 sm:$0xff] }
 0x42c   :  { %646 = vst.msk [vmem:[%s2204_s14 + $0x20] sm:$0xff] %vm164_vm2, %v638_v50  ;;  %v654_v52 = vpack.c.bf16 %v638_v50, %v638_v50  ;;  %1614 = vmatprep.mubr.msk.bf16.mxu0 %vm1776_vm0, %v1775_v0 }
 0x42d   :  { %v1715_v53 = vpop.eup %1714 }
 0x42e   :  { %v640_v55 = vmul.f32 %v1715_v53, %v2033_v10  ;;  %1581 = vmatmul.mubr.msk.bf16.vlgmr.msra.gmra.mrb[24].mxu1 %vm164_vm2, %v654_v52 }
 0x42f   :  { %1591 = vmatpush3.bf16.msra.mxu1 %v953_v54  ;;  %1592 = vmatprep.mubr.msk.bf16.mxu1 %vm1776_vm0, %v1775_v0 }
 0x430   :  { %648 = vst.msk [vmem:[%s2204_s14 + $0x30] sm:$0xff] %vm164_vm2, %v640_v55  ;;  %1602 = vmatprep.subr.bf16.mxu1 %v1775_v0  ;;  %v656_v29 = vpack.c.bf16 %v640_v55, %v640_v55  ;;  %s1781_s14 = smov 8  }
 0x436   :  { %1593 = vmatmul.mubr.msk.bf16.vlgmr.msra.gmra.mrb[28].mxu1 %vm164_vm2, %v656_v29 }
 0x437   :  { %1606 = vmatprep.mubr.msk.bf16.mxu1 %vm1776_vm0, %v1775_v0  ;;  %1603 = vmatpush3.bf16.msra.mxu1 %v1676_v14 }
 0x438   :  { %1604 = vmatprep.subr.bf16.mxu1 %v1775_v0 }
 0x43b   :  { %1605 = vmatpush3.bf16.msra.mxu1 %v1677_v22  ;;  %v1439_v22 = vld [vmem:[%s2196_s6] ss:$0 sm:$0xff] }
 0x43c   :  { %1618 = vmatprep.subr.bf16.mxu1 %v1775_v0 }
 0x473   :  { %v701_v56 = vpop.f32.mrb[16].mxu1 }
 0x474   :  { %v749_v57 = vpop.f32.mrb[20].mxu0  ;;  %v1558_v58 = vpop.f32.mrb[17].mxu1 }
 0x475   :  { %v1564_v59 = vpop.f32.mrb[21].mxu0  ;;  %v704_v60 = vpop.f32.mrb[18].mxu1 }
 0x476   :  { %v752_v61 = vpop.f32.mrb[22].mxu0  ;;  %v1559_v62 = vpop.f32.mrb[19].mxu1 }
 0x477   :  { %v1565_v63 = vpop.f32.mrb[23].mxu0 }
 0x4cc   :  { %v797_v1 = vpop.f32.mrb[20].mxu1 }
 0x4cd   :  { %v845_v2 = vpop.f32.mrb[24].mxu0  ;;  %v1570_v5 = vpop.f32.mrb[21].mxu1 }
 0x4ce   :  { %v1659_v6 = vpack.i.bf16 %v845_v2, %v797_v1  ;;  %v1576_v7 = vpop.f32.mrb[25].mxu0  ;;  %v800_v8 = vpop.f32.mrb[22].mxu1 }
 0x4cf   :  { %v848_v9 = vpop.f32.mrb[26].mxu0  ;;  %v1571_v11 = vpop.f32.mrb[23].mxu1  ;;  %v1678_v7 = vld [vmem:[#allocation2] sm:$0xff]  }
 0x4d0   :  { %1660 = vrot.lane.b32.xlu1 %v1659_v6, %s1781_s14  ;;  %v1577_v12 = vpop.f32.mrb[27].mxu0  ;;  %1611 = vmatpush3.bf16.msra.mxu0 %v1678_v7  ;;  %v1680_v8 = vld [vmem:[%s2199_s9] sm:$0xff]   ;;  %v1681_v9 = vld [vmem:[%s2199_s9 + $0x8] sm:$0xff]  }
 0x4d1   :  { %1612 = vmatprep.subr.bf16.mxu0 %v1775_v0  ;;  %v1451_v7 = vld [vmem:[%s2202_s12] ss:$0 sm:$0xff] }
 0x4d5   :  { %v941_v13 = vpop.f32.mrb[28].mxu0 }
 0x4d6   :  { %v1588_v28 = vpop.f32.mrb[29].mxu0 }
 0x4d7   :  { %v944_v10 = vpop.f32.mrb[30].mxu0 }
 0x4d8   :  { %v1589_v33 = vpop.f32.mrb[31].mxu0 }
 0x4fe   :  { %v1037_v15 = vpop.f32.mrb[32].mxu0 }
 0x4ff   :  { %v1600_v16 = vpop.f32.mrb[33].mxu0 }
 0x500   :  { %v1040_v17 = vpop.f32.mrb[34].mxu0  ;;  %v1438_v16 = vld [vmem:[%s2195_s5] ss:$0 sm:$0xff] }
 0x501   :  { %v893_v18 = vpop.f32.mrb[24].mxu1  ;;  %v1601_v19 = vpop.f32.mrb[35].mxu0 }
 0x502   :  { %v1664_v23 = vpack.i.bf16 %v941_v13, %v893_v18  ;;  %v1582_v24 = vpop.f32.mrb[25].mxu1 }
 0x503   :  { %v896_v25 = vpop.f32.mrb[26].mxu1 }
 0x504   :  { %v1583_v26 = vpop.f32.mrb[27].mxu1  ;;  %1665 = vrot.lane.b32.xlu0 %v1664_v23, %s1782_s2 }
 0x509   :  { %v989_v27 = vpop.f32.mrb[28].mxu1 }
 0x50a   :  { %v1669_v30 = vpack.i.bf16 %v1037_v15, %v989_v27  ;;  %v1594_v31 = vpop.f32.mrb[29].mxu1  ;;  %v1682_v27 = vld [vmem:[%s2199_s9 + $0x10] sm:$0xff]  }
 0x50b   :  { %v992_v32 = vpop.f32.mrb[30].mxu1  ;;  %v1440_v31 = vld [vmem:[%s2198_s8] ss:$0 sm:$0xff] }
 0x50c   :  { %v1595_v35 = vpop.f32.mrb[31].mxu1  ;;  %1670 = vrot.lane.b32.xlu1 %v1669_v30, %s1783_s22  ;;  %v1683_v30 = vld [vmem:[%s2199_s9 + $0x18] sm:$0xff]  }
 0x542   :  { %v1661_v36 = vpop.permute.xlu1 %1660 }
 0x543   :  { %v1663_v37 = vunpack.i.h.bf16 %v1661_v36  ;;  %v1662_v38 = vunpack.i.l.bf16 %v1661_v36 }
 0x545   :  { %v1068_v42 = vsel %vm164_vm2, %v749_v57, %v1663_v37  ;;  %v1067_v43 = vsel %vm164_vm2, %v701_v56, %v1662_v38 }
 0x576   :  { %v1666_v34 = vpop.permute.xlu0 %1665 }
 0x577   :  { %v1668_v39 = vunpack.i.h.bf16 %v1666_v34  ;;  %v1667_v40 = vunpack.i.l.bf16 %v1666_v34 }
 0x579   :  { %v1071_v20 = vsel %vm1069_vm4, %v1068_v42, %v1668_v39  ;;  %v1070_v21 = vsel %vm1069_vm4, %v1067_v43, %v1667_v40 }
 0x57e   :  { %v1671_v41 = vpop.permute.xlu1 %1670 }
 0x57f   :  { %v1673_v44 = vunpack.i.h.bf16 %v1671_v41  ;;  %v1672_v45 = vunpack.i.l.bf16 %v1671_v41 }
 0x581   :  { %v1074_v46 = vsel %vm1072_vm5, %v1071_v20, %v1673_v44  ;;  %v1073_v47 = vsel %vm1072_vm5, %v1070_v21, %v1672_v45 }
 0x582   :  { %v1075_v48 = vpack.c.bf16 %v1074_v46, %v1073_v47 }
 0x584   :  { %1607 = vmatmul.mubr.msk.bf16.vlgmr.msra.gmra.mrb[32].mxu1 %vm88_vm1, %v1075_v48 }
 0x585   :  { %1626 = vmatprep.mubr.msk.bf16.mxu1 %vm1776_vm0, %v1775_v0  ;;  %1619 = vmatpush3.bf16.msra.mxu1 %v1680_v8 }
 0x586   :  { %1620 = vmatprep.subr.bf16.mxu1 %v1775_v0 }
 0x589   :  { %1621 = vmatpush3.bf16.msra.mxu1 %v1681_v9 }
 0x58a   :  { %1622 = vmatprep.subr.bf16.mxu1 %v1775_v0 }
 0x58d   :  { %1623 = vmatpush3.bf16.msra.mxu1 %v1682_v27 }
 0x58e   :  { %1624 = vmatprep.subr.bf16.mxu1 %v1775_v0  ;;  %v1444_v0 = vld [vmem:[%s2200_s10] ss:$0 sm:$0xff] }
 0x591   :  { %1625 = vmatpush3.bf16.msra.mxu1 %v1683_v30 }
 0x657   :  { %v1136_v50 = vpop.f32.mrb[32].mxu1 }
 0x658   :  { %v1137_v51 = vadd.f32 %v1434_v49, %v1136_v50  ;;  %v1608_v52 = vpop.f32.mrb[33].mxu1 }
 0x659   :  { %v1139_v53 = vpop.f32.mrb[34].mxu1 }
 0x65a   :  { %v1140_v54 = vadd.f32 %v1434_v49, %v1139_v53  ;;  %v1609_v55 = vpop.f32.mrb[35].mxu1  ;;  %v1143_v29 = vadd.f32 %v1137_v51, %v1890_v3 }
 0x65c   :  { %v1147_v56 = vsel %vm88_vm1, %v1143_v29, 0.0  ;;  %v1144_v57 = vadd.f32 %v1140_v54, %v1895_v4  ;;  %v1679_v4 = vld [vmem:[#allocation2 + $0x8] sm:$0xff]  }
 0x65d   :  { %1148 = vadd.xlane.f32.xlu0 %v1147_v56  ;;  %1613 = vmatpush3.bf16.msra.mxu0 %v1679_v4 }
 0x65e   :  { %v1150_v58 = vsel %vm88_vm1, %v1144_v57, 0.0 }
 0x65f   :  { %1151 = vadd.xlane.f32.xlu1 %v1150_v58 }
 0x6ea   :  { %v1149_v59 = vpop.xlane.xlu0 %1148 }
 0x6eb   :  { %v1154_v60 = vmul.f32 0.03125, %v1149_v59 }
 0x6ec   :  { %v1152_v61 = vpop.xlane.xlu1 %1151 }
 0x6ed   :  { %v1156_v62 = vsub.f32 %v1143_v29, %v1154_v60  ;;  %v1155_v63 = vmul.f32 0.03125, %v1152_v61 }
 0x6ef   :  { %v1157_v1 = vsub.f32 %v1144_v57, %v1155_v63  ;;  %v1158_v2 = vmul.f32 %v1156_v62, %v1156_v62 }
 0x6f1   :  { %v1160_v5 = vsel %vm88_vm1, %v1158_v2, 0.0  ;;  %v1159_v6 = vmul.f32 %v1157_v1, %v1157_v1 }
 0x6f2   :  { %1161 = vadd.xlane.f32.xlu0 %v1160_v5  ;;  %v1450_v5 = vld [vmem:[%s2201_s11] ss:$0 sm:$0xff] }
 0x6f3   :  { %v1163_v3 = vsel %vm88_vm1, %v1159_v6, 0.0 }
 0x6f6   :  { %1164 = vadd.xlane.f32.xlu0 %v1163_v3 }
 0x77f   :  { %v1162_v11 = vpop.xlane.xlu0 %1161 }
 0x780   :  { %v1166_v12 = vmul.f32 0.03125, %v1162_v11 }
 0x782   :  { %v1168_v13 = vadd.f32 1e-05, %v1166_v12 }
 0x783   :  { %v1165_v28 = vpop.xlane.xlu0 %1164 }
 0x784   :  { %1716 = vrsqrt.f32 %v1168_v13  ;;  %v1167_v10 = vmul.f32 0.03125, %v1165_v28 }
 0x786   :  { %v1169_v33 = vadd.f32 1e-05, %v1167_v10 }
 0x788   :  { %1718 = vrsqrt.f32 %v1169_v33 }
 0x78e   :  { %v1717_v14 = vpop.eup %1716 }
 0x78f   :  { %v1172_v15 = vmul.f32 %v1717_v14, %v1156_v62 }
 0x791   :  { %v1180_v18 = vmul.f32 %v1438_v16, %v1172_v15 }
 0x792   :  { %v1719_v17 = vpop.eup %1718 }
 0x793   :  { %v1173_v19 = vmul.f32 %v1719_v17, %v1157_v1  ;;  %v1188_v24 = vadd.f32 %v1439_v22, %v1180_v18 }
 0x795   :  { %v1181_v23 = vmul.f32 %v1438_v16, %v1173_v19 }
 0x797   :  { %v1189_v25 = vadd.f32 %v1439_v22, %v1181_v23 }
 0x799   :  { %v1190_v26 = vpack.c.bf16 %v1189_v25, %v1188_v24 }
 0x79b   :  { %1615 = vmatmul.mubr.msk.bf16.vlgmr.msra.gmra.mrb[36].mxu0 %vm88_vm1, %v1190_v26 }
 0x86e   :  { %v1251_v32 = vpop.f32.mrb[36].mxu0 }
 0x86f   :  { %v1252_v35 = vadd.f32 %v1440_v31, %v1251_v32  ;;  %v1616_v36 = vpop.f32.mrb[37].mxu0 }
 0x870   :  { %v1254_v34 = vpop.f32.mrb[38].mxu0 }
 0x871   :  { %v1255_v37 = vadd.f32 %v1440_v31, %v1254_v34  ;;  %v1617_v38 = vpop.f32.mrb[39].mxu0  ;;  %v1258_v39 = vmax.f32 %v1252_v35, 0.0 }
 0x873   :  { %v1259_v40 = vmax.f32 %v1255_v37, 0.0 }
 0x875   :  { %v1260_v41 = vpack.c.bf16 %v1259_v40, %v1258_v39 }
 0x877   :  { %1627 = vmatmul.mubr.msk.bf16.vlgmr.msra.gmra.mrb[36].mxu1 %vm1300_vm6, %v1260_v41 }
 0x94a   :  { %v1338_v42 = vpop.f32.mrb[36].mxu1 }
 0x94b   :  { %v1339_v43 = vadd.f32 %v1444_v0, %v1338_v42  ;;  %v1628_v44 = vpop.f32.mrb[37].mxu1 }
 0x94c   :  { %v1341_v45 = vpop.f32.mrb[38].mxu1 }
 0x94d   :  { %v1342_v20 = vadd.f32 %v1444_v0, %v1341_v45  ;;  %v1629_v21 = vpop.f32.mrb[39].mxu1  ;;  %v1345_v46 = vadd.f32 %v1339_v43, %v1188_v24 }
 0x94f   :  { %v1349_v47 = vsel %vm88_vm1, %v1345_v46, 0.0  ;;  %v1346_v48 = vadd.f32 %v1342_v20, %v1189_v25 }
 0x950   :  { %1350 = vadd.xlane.f32.xlu1 %v1349_v47 }
 0x951   :  { %v1352_v49 = vsel %vm88_vm1, %v1346_v48, 0.0 }
 0x952   :  { %1353 = vadd.xlane.f32.xlu0 %v1352_v49 }
 0x9dd   :  { %v1351_v50 = vpop.xlane.xlu1 %1350 }
 0x9de   :  { %v1355_v51 = vmul.f32 0.03125, %v1351_v50 }
 0x9df   :  { %v1354_v52 = vpop.xlane.xlu0 %1353 }
 0x9e0   :  { %v1357_v53 = vsub.f32 %v1345_v46, %v1355_v51  ;;  %v1356_v54 = vmul.f32 0.03125, %v1354_v52 }
 0x9e2   :  { %v1358_v55 = vsub.f32 %v1346_v48, %v1356_v54  ;;  %v1359_v29 = vmul.f32 %v1357_v53, %v1357_v53 }
 0x9e4   :  { %v1361_v56 = vsel %vm88_vm1, %v1359_v29, 0.0  ;;  %v1360_v57 = vmul.f32 %v1358_v55, %v1358_v55 }
 0x9e5   :  { %1362 = vadd.xlane.f32.xlu1 %v1361_v56 }
 0x9e6   :  { %v1364_v58 = vsel %vm88_vm1, %v1360_v57, 0.0 }
 0x9e7   :  { %1365 = vadd.xlane.f32.xlu0 %v1364_v58 }
 0xa72   :  { %v1363_v59 = vpop.xlane.xlu1 %1362 }
 0xa73   :  { %v1367_v60 = vmul.f32 0.03125, %v1363_v59 }
 0xa74   :  { %v1366_v61 = vpop.xlane.xlu0 %1365 }
 0xa75   :  { %v1369_v62 = vadd.f32 1e-05, %v1367_v60  ;;  %v1368_v63 = vmul.f32 0.03125, %v1366_v61 }
 0xa77   :  { %1720 = vrsqrt.f32 %v1369_v62  ;;  %v1370_v1 = vadd.f32 1e-05, %v1368_v63 }
 0xa79   :  { %1722 = vrsqrt.f32 %v1370_v1 }
 0xa81   :  { %v1721_v2 = vpop.eup %1720 }
 0xa82   :  { %v1373_v6 = vmul.f32 %v1721_v2, %v1357_v53 }
 0xa83   :  { %v1723_v3 = vpop.eup %1722 }
 0xa84   :  { %v1381_v4 = vmul.f32 %v1450_v5, %v1373_v6  ;;  %v1374_v8 = vmul.f32 %v1723_v3, %v1358_v55 }
 0xa86   :  { %v1382_v9 = vmul.f32 %v1450_v5, %v1374_v8  ;;  %v1389_v11 = vadd.f32 %v1451_v7, %v1381_v4 }
 0xa88   :  { %v1390_v12 = vadd.f32 %v1451_v7, %v1382_v9  ;;  %1391 = vst.msk [vmem:[#allocation5] sm:$0xff] %vm88_vm1, %v1389_v11 }
 0xa8a   :  { %1392 = vst.msk [vmem:[#allocation5 + $0x8] sm:$0xff] %vm88_vm1, %v1390_v12 }
 0xa8b   :  { %1757 = shalt.err (!%p1754_p12)
}
 0xa8c   :  { %s1758_s2 = scalar_lea.hbm %s2203_s13, 256 }
 0xa8d   :  { %p1759_p13 = scmp.ne.s32.totalorder %s2203_s13, %s1758_s2  ;;  %p1762_p0 = scmp.lt.u32.totalorder %s1758_s2, %s2203_s13 }
 0xa8f   :  { %p1764_p1 = pnand %p1762_p0, %p1759_p13 }
 0xa91   :  { %1767 = shalt.err (!%p1764_p1)
}
 0xa92   :  { %s1785_s25 = smov 128  }
 0xa93   :  { %1404 = dma.vmem_to_hbm [thread:$0]  %s1399_s20, 256, %s2203_s13, [#allocation4], %s1785_s25, %s1785_s25, %s1781_s14  }
 0xa94   :  { %1770 = dma.done.wait [#allocation4], 256  }
 0xa95   :  { %1771 = vsyncadd [#allocation4], 4294967040 }
 0xa96   :  { %1412 = vsyncpa [#allocation3], 1 }
 0xa97   :  { %1413 = vsyncpa [#allocation4], 1 }

</bundles_post_ra>
